<compile_context>
chip_gen: v5e
topology: v5e:2x2
jax: 0.10.0
libtpu: 0.0.40
codegen_flags: <defaults>
</compile_context>

<pallas_src>
import functools

import jax
import jax.numpy as jnp
from jax.experimental import pallas as pl
from jax.experimental.pallas import tpu as pltpu


def _pool_kernel(x_ref, avg_ref, max_ref):
    """Per-pixel channel mean & max for one (1, C, t) tile."""
    xv = x_ref[0].astype(jnp.float32)                      # (C, t)
    avg_ref[0] = jnp.mean(xv, axis=0, keepdims=True)       # (1, t)
    max_ref[0] = jnp.max(xv, axis=0, keepdims=True)        # (1, t)


def _apply_kernel(x_ref, logit_ref, o_ref):
    """out = x * sigmoid(conv_logits); attention broadcast over channels."""
    z = logit_ref[0].astype(jnp.float32)                   # (1, t)
    attn = 1.0 / (1.0 + jnp.exp(-z))                       # sigmoid via EUP exp
    o_ref[0] = (x_ref[0].astype(jnp.float32) * attn).astype(o_ref.dtype)


def _pick_hw_tile(hw, c, *, max_bytes=2 << 20):
    """Largest lane tile t that divides hw, is a multiple of 128 (or == hw),
    and keeps a (C, t) f32 block small enough to double-buffer in VMEM."""
    if c * hw * 4 <= max_bytes or hw % 128 != 0:
        return hw
    t = hw
    while c * t * 4 > max_bytes and t % 256 == 0:
        t //= 2
    return t


@functools.partial(jax.jit, static_argnames=("kernel_size",))
def spatial_attention_forward(x, weight, *, kernel_size=7):
    """SpatialAttention forward.

    x:      (B, C, H, W) float32, NCHW
    weight: (1, 2, k, k) Conv2d weight (no bias), k in {3, 7}
    returns (B, C, H, W) float32, NCHW
    """
    assert kernel_size in (3, 7), "kernel size must be 3 or 7"
    pad = 3 if kernel_size == 7 else 1
    B, C, H, W = x.shape
    HW = H * W
    xf = x.reshape(B, C, HW)            # NCHW is already channel-major: free reshape
    t = _pick_hw_tile(HW, C)
    grid = (B, HW // t)
    params = pltpu.CompilerParams(dimension_semantics=("parallel", "parallel"))

    # ---- Pass 1: per-pixel channel mean / max (one pass over x) ----
    avg_map, max_map = pl.pallas_call(
        _pool_kernel,
        out_shape=(jax.ShapeDtypeStruct((B, 1, HW), jnp.float32),
                   jax.ShapeDtypeStruct((B, 1, HW), jnp.float32)),
        grid=grid,
        in_specs=[pl.BlockSpec((1, C, t), lambda b, i: (b, 0, i))],
        out_specs=(pl.BlockSpec((1, 1, t), lambda b, i: (b, 0, i)),
                   pl.BlockSpec((1, 1, t), lambda b, i: (b, 0, i))),
        compiler_params=params,
    )(xf)

    # ---- Tiny 2-channel 'same' conv: XLA glue (traffic ~ 2/C of x) ----
    # TODO(synk): could be folded into pass 2 with an in-kernel halo conv, but the
    # pooled map is C-times smaller than x, so the payoff is negligible.
    pooled = jnp.concatenate([avg_map, max_map], axis=1).reshape(B, 2, H, W)
    logits = jax.lax.conv_general_dilated(
        pooled, weight.astype(jnp.float32),
        window_strides=(1, 1), padding=[(pad, pad), (pad, pad)],
        dimension_numbers=("NCHW", "OIHW", "NCHW"),
    ).reshape(B, 1, HW)

    # ---- Pass 2: out = x * sigmoid(logits) (one read of x, one write) ----
    out = pl.pallas_call(
        _apply_kernel,
        out_shape=jax.ShapeDtypeStruct((B, C, HW), x.dtype),
        grid=grid,
        in_specs=[pl.BlockSpec((1, C, t), lambda b, i: (b, 0, i)),
                  pl.BlockSpec((1, 1, t), lambda b, i: (b, 0, i))],
        out_specs=pl.BlockSpec((1, C, t), lambda b, i: (b, 0, i)),
        compiler_params=params,
    )(xf, logits)

    return out.reshape(B, C, H, W)


def _reference(x, weight, kernel_size=7):
    """Pure-JAX reference of the PyTorch module (eval semantics)."""
    pad = 3 if kernel_size == 7 else 1
    avg = jnp.mean(x, axis=1, keepdims=True)
    mx = jnp.max(x, axis=1, keepdims=True)
    pooled = jnp.concatenate([avg, mx], axis=1)
    logits = jax.lax.conv_general_dilated(
        pooled, weight, (1, 1), [(pad, pad), (pad, pad)],
        dimension_numbers=("NCHW", "OIHW", "NCHW"))
    return x * jax.nn.sigmoid(logits)


if __name__ == "__main__":
    key = jax.random.PRNGKey(0)
    k_x, k_w = jax.random.split(key, 2)

    B, C, H, W = 2, 4, 16, 16
    ksize = 7

    x = jax.random.normal(k_x, (B, C, H, W), dtype=jnp.float32)
    # Conv2d(2, 1, k, padding=k//2, bias=False) weight
    weight = jax.random.normal(k_w, (1, 2, ksize, ksize), dtype=jnp.float32) * 0.1

    out = spatial_attention_forward(x, weight, kernel_size=ksize)
    out = jax.block_until_ready(out)

    ref = _reference(x, weight, ksize)
    assert out.shape == (B, C, H, W), out.shape
    assert jnp.allclose(out, ref, atol=1e-5, rtol=1e-5), (
        "mismatch vs reference, max abs err = "
        + str(float(jnp.max(jnp.abs(out - ref)))))

    print("KERNEL_OK")
</pallas_src>

<mosaic_0001>
module attributes {stable_mosaic.version = 11 : i64} {
  func.func @_pool_kernel(%arg0: i32, %arg1: i32, %arg2: memref<1x4x256xf32, #tpu.memory_space<vmem>>, %arg3: memref<1x1x256xf32, #tpu.memory_space<vmem>>, %arg4: memref<1x1x256xf32, #tpu.memory_space<vmem>>) attributes {dimension_semantics = [#tpu.dimension_semantics<parallel>, #tpu.dimension_semantics<parallel>], iteration_bounds = array<i64: 2, 1>, scalar_prefetch = 0 : i64, scratch_operands = 0 : i64, tpu.core_type = #tpu.core_type<tc>, window_params = [{transform_indices = @transform_0, window_bounds = array<i64: 1, 4, 256>}, {transform_indices = @transform_1, window_bounds = array<i64: 1, 1, 256>}, {transform_indices = @transform_2, window_bounds = array<i64: 1, 1, 256>}]} {
    %c0 = arith.constant 0 : index
    %c0_0 = arith.constant 0 : index
    %c0_1 = arith.constant 0 : index
    %0 = vector.load %arg2[%c0, %c0_0, %c0_1] : memref<1x4x256xf32, #tpu.memory_space<vmem>>, vector<1x4x256xf32>
    %1 = vector.shape_cast %0 : vector<1x4x256xf32> to vector<4x256xf32>
    %cst = arith.constant dense<0.000000e+00> : vector<256xf32>
    %2 = vector.multi_reduction <add>, %1, %cst [0] : vector<4x256xf32> to vector<256xf32>
    %3 = vector.shape_cast %2 : vector<256xf32> to vector<1x256xf32>
    %cst_2 = arith.constant 4.000000e+00 : f32
    %4 = vector.broadcast %cst_2 : f32 to vector<1x256xf32>
    %5 = arith.divf %3, %4 : vector<1x256xf32>
    %c0_3 = arith.constant 0 : index
    %c0_4 = arith.constant 0 : index
    %c0_5 = arith.constant 0 : index
    %6 = vector.load %arg3[%c0_3, %c0_4, %c0_5] : memref<1x1x256xf32, #tpu.memory_space<vmem>>, vector<1x1x256xf32>
    %7 = vector.shape_cast %6 : vector<1x1x256xf32> to vector<1x256xf32>
    %8 = vector.shape_cast %5 : vector<1x256xf32> to vector<1x1x256xf32>
    tpu.vector_store %arg3[%c0_3, %c0_4, %c0_5], %8 {strides = array<i32>} : memref<1x1x256xf32, #tpu.memory_space<vmem>>, vector<1x1x256xf32>,
    %cst_6 = arith.constant dense<0xFF800000> : vector<256xf32>
    %9 = vector.multi_reduction <maximumf>, %1, %cst_6 [0] : vector<4x256xf32> to vector<256xf32>
    %10 = vector.shape_cast %9 : vector<256xf32> to vector<1x256xf32>
    %c0_7 = arith.constant 0 : index
    %c0_8 = arith.constant 0 : index
    %c0_9 = arith.constant 0 : index
    %11 = vector.load %arg4[%c0_7, %c0_8, %c0_9] : memref<1x1x256xf32, #tpu.memory_space<vmem>>, vector<1x1x256xf32>
    %12 = vector.shape_cast %11 : vector<1x1x256xf32> to vector<1x256xf32>
    %13 = vector.shape_cast %10 : vector<1x256xf32> to vector<1x1x256xf32>
    tpu.vector_store %arg4[%c0_7, %c0_8, %c0_9], %13 {strides = array<i32>} : memref<1x1x256xf32, #tpu.memory_space<vmem>>, vector<1x1x256xf32>,
    return
  }
  func.func @transform_0(%arg0: i32, %arg1: i32) -> (i32, i32, i32) {
    %c0_i32 = arith.constant 0 : i32
    %c0_i32_0 = arith.constant 0 : i32
    return %arg0, %c0_i32, %arg1 : i32, i32, i32
  }
  func.func @transform_1(%arg0: i32, %arg1: i32) -> (i32, i32, i32) {
    %c0_i32 = arith.constant 0 : i32
    %c0_i32_0 = arith.constant 0 : i32
    return %arg0, %c0_i32, %arg1 : i32, i32, i32
  }
  func.func @transform_2(%arg0: i32, %arg1: i32) -> (i32, i32, i32) {
    %c0_i32 = arith.constant 0 : i32
    %c0_i32_0 = arith.constant 0 : i32
    return %arg0, %c0_i32, %arg1 : i32, i32, i32
  }
}

module attributes {stable_mosaic.version = 11 : i64} {
  func.func @_apply_kernel(%arg0: i32, %arg1: i32, %arg2: memref<1x4x256xf32, #tpu.memory_space<vmem>>, %arg3: memref<1x1x256xf32, #tpu.memory_space<vmem>>, %arg4: memref<1x4x256xf32, #tpu.memory_space<vmem>>) attributes {dimension_semantics = [#tpu.dimension_semantics<parallel>, #tpu.dimension_semantics<parallel>], iteration_bounds = array<i64: 2, 1>, scalar_prefetch = 0 : i64, scratch_operands = 0 : i64, tpu.core_type = #tpu.core_type<tc>, window_params = [{transform_indices = @transform_0, window_bounds = array<i64: 1, 4, 256>}, {transform_indices = @transform_1, window_bounds = array<i64: 1, 1, 256>}, {transform_indices = @transform_2, window_bounds = array<i64: 1, 4, 256>}]} {
    %c0 = arith.constant 0 : index
    %c0_0 = arith.constant 0 : index
    %c0_1 = arith.constant 0 : index
    %0 = vector.load %arg3[%c0, %c0_0, %c0_1] : memref<1x1x256xf32, #tpu.memory_space<vmem>>, vector<1x1x256xf32>
    %1 = vector.shape_cast %0 : vector<1x1x256xf32> to vector<1x256xf32>
    %cst = arith.constant 0.000000e+00 : f32
    %2 = vector.broadcast %cst : f32 to vector<1x256xf32>
    %3 = arith.subf %2, %1 : vector<1x256xf32>
    %4 = math.exp %3 : vector<1x256xf32>
    %cst_2 = arith.constant 1.000000e+00 : f32
    %5 = vector.broadcast %cst_2 : f32 to vector<1x256xf32>
    %6 = arith.addf %5, %4 : vector<1x256xf32>
    %cst_3 = arith.constant 1.000000e+00 : f32
    %7 = vector.broadcast %cst_3 : f32 to vector<1x256xf32>
    %8 = arith.divf %7, %6 : vector<1x256xf32>
    %c0_4 = arith.constant 0 : index
    %c0_5 = arith.constant 0 : index
    %c0_6 = arith.constant 0 : index
    %9 = vector.load %arg2[%c0_4, %c0_5, %c0_6] : memref<1x4x256xf32, #tpu.memory_space<vmem>>, vector<1x4x256xf32>
    %10 = vector.shape_cast %9 : vector<1x4x256xf32> to vector<4x256xf32>
    %11 = vector.broadcast %8 : vector<1x256xf32> to vector<4x256xf32>
    %12 = arith.mulf %10, %11 : vector<4x256xf32>
    %c0_7 = arith.constant 0 : index
    %c0_8 = arith.constant 0 : index
    %c0_9 = arith.constant 0 : index
    %13 = vector.load %arg4[%c0_7, %c0_8, %c0_9] : memref<1x4x256xf32, #tpu.memory_space<vmem>>, vector<1x4x256xf32>
    %14 = vector.shape_cast %13 : vector<1x4x256xf32> to vector<4x256xf32>
    %15 = vector.shape_cast %12 : vector<4x256xf32> to vector<1x4x256xf32>
    tpu.vector_store %arg4[%c0_7, %c0_8, %c0_9], %15 {strides = array<i32>} : memref<1x4x256xf32, #tpu.memory_space<vmem>>, vector<1x4x256xf32>,
    return
  }
  func.func @transform_0(%arg0: i32, %arg1: i32) -> (i32, i32, i32) {
    %c0_i32 = arith.constant 0 : i32
    %c0_i32_0 = arith.constant 0 : i32
    return %arg0, %c0_i32, %arg1 : i32, i32, i32
  }
  func.func @transform_1(%arg0: i32, %arg1: i32) -> (i32, i32, i32) {
    %c0_i32 = arith.constant 0 : i32
    %c0_i32_0 = arith.constant 0 : i32
    return %arg0, %c0_i32, %arg1 : i32, i32, i32
  }
  func.func @transform_2(%arg0: i32, %arg1: i32) -> (i32, i32, i32) {
    %c0_i32 = arith.constant 0 : i32
    %c0_i32_0 = arith.constant 0 : i32
    return %arg0, %c0_i32, %arg1 : i32, i32, i32
  }
}

</mosaic_0001>

<bundles_post_ra>
// kernel: spatial_attention_forward.2
= control target key start
LH: loop header
LB: loop body
LE: loop exit
PB: predicated region body
PF: predicated region fallthrough
CT: control target
= control target key end

     0   :  { %s474_s9 = smov 0   ;;  %s476_s10 = smov 0   ;;  %s518_s0 = inlined_call_operand.vmem [shape: f32[2,4,256], index: 0, kind: input, shape index: {}]   ;;  %s519_s1 = inlined_call_operand.vmem [shape: f32[2,1,256], index: 1, kind: output, shape index: {0}]   ;;  %s520_s2 = inlined_call_operand.vmem [shape: f32[2,1,256], index: 2, kind: output, shape index: {1}]  }
   0x1   :  { %s478_s11 = smov 0  }
   0x2 LB: > { %s25_s12 = sadd.s32 1, %s452_s10  ;;  %p399_p0 = scmp.ge.s32.totalorder %s456_s11, 1  ;;  %s456_s11 = sphi %s478_s11, %s13_s11   ;;  %s452_s10 = sphi %s476_s10, %s522_s10   ;;  %s448_s9 = sphi %s474_s9, %s521_s9  }
   0x3   : > { %p27_p1 = scmp.ge.s32.totalorder %s25_s12, 2  ;;  %p138_p2 = scmp.lt.s32.totalorder %s456_s11, 3 }
   0x5   : > { %s524_s12 = smov (%p27_p1, %s25_s12), 0  ;;  %p139_p3 = pnand %p399_p0, %p138_p2 }
   0x6   : > { %p176_p4 = scmp.lt.s32.totalorder (!%p139_p3), %s448_s9, 1 }
   0x7   : > { %142 = sbr.rel (%p139_p3) target bundleno = 49 (0x31), region = 24 }
   0xc   : > { %v458_v0 = vmov 4.0   ;;  %s526_s9 = smov (!%p176_p4, %s448_s9), 1  ;;  %vm210_vm0 = vcmask 1043456   ;;  %v240_v28 = vlaneseq  ;;  %vm237_vm2 = vcmask 1040384  }
   0xd   : > { %432 = vrcp.f32 %v458_v0  ;;  %s406_s13 = sshll.u32 %s526_s9, 3  ;;  %s402_s17 = sshll.u32 %s526_s9, 1 }
   0xe   : > { %s183_s16 = scalar_lea.vmem %s518_s0, %s406_s13  ;;  %vm242_vm3 = vcmp.lt.s32.totalorder %v240_v28, 256  ;;  %s192_s20 = scalar_lea.vmem %s519_s1, %s402_s17 }
   0xf   : > { %v203_v1 = vld [vmem:[%s183_s16] sm:$0xff]  ;;  %s201_s23 = scalar_lea.vmem %s520_s2, %s402_s17 }
  0x10   : > { %205 = vst [vmem:[#allocation1] ss:$2 sm:$0xff] %v203_v1 }
  0x13   : > { %v433_v2 = vpop.eup %432 }
  0x14   : > { %v226_v3 = vmul.f32 4.0, %v433_v2  ;;  %vm230_vm1 = vweird.f32 %v433_v2 }
  0x16   : > { %v227_v4 = vsub.f32 1.0, %v226_v3 }
  0x17   : > { %v206_v5 = vld.sshfl [vmem:[#allocation1] sm:$0xff pattern:$0x75316420]  ;;  %v207_v6 = vld.sshfl [vmem:[#allocation1 + $0x8] sm:$0xff pattern:$0x75316420] }
  0x18   : > { %v211_v7 = vsel %vm210_vm0, %v206_v5, 0.0  ;;  %v218_v8 = vsel %vm210_vm0, %v207_v6, 0.0  ;;  %245 = vst [vmem:[#allocation1] ss:$2 sm:$0xff] %v203_v1  ;;  %v228_v11 = vmul.f32 %v433_v2, %v227_v4 }
  0x19   : > { %v212_v9 = vrot.slane %v211_v7, 4  ;;  %v219_v10 = vrot.slane %v218_v8, 4 }
  0x1a   : > { %v229_v16 = vadd.f32 %v433_v2, %v228_v11 }
  0x1b   : > { %v213_v12 = vadd.f32 %v212_v9, %v211_v7  ;;  %v220_v13 = vadd.f32 %v219_v10, %v218_v8 }
  0x1c   : > { %v231_v27 = vsel %vm230_vm1, %v433_v2, %v229_v16 }
  0x1d   : > { %v214_v14 = vrot.slane %v213_v12, 2  ;;  %v221_v15 = vrot.slane %v220_v13, 2 }
  0x1f   : > { %v215_v17 = vadd.f32 %v214_v14, %v213_v12  ;;  %v222_v18 = vadd.f32 %v221_v15, %v220_v13  ;;  %v246_v19 = vld.sshfl [vmem:[#allocation1] sm:$0xff pattern:$0x75316420]  ;;  %v247_v20 = vld.sshfl [vmem:[#allocation1 + $0x8] sm:$0xff pattern:$0x75316420] }
  0x20   : > { %v250_v21 = vsel %vm210_vm0, %v246_v19, -inf  ;;  %v257_v22 = vsel %vm210_vm0, %v247_v20, -inf }
  0x21   : > { %v216_v23 = vrot.slane %v215_v17, 1  ;;  %v223_v24 = vrot.slane %v222_v18, 1  ;;  %v251_v25 = vrot.slane %v250_v21, 4  ;;  %v258_v26 = vrot.slane %v257_v22, 4 }
  0x23   : > { %v217_v29 = vadd.f32 %v216_v23, %v215_v17  ;;  %v224_v30 = vadd.f32 %v223_v24, %v222_v18  ;;  %v252_v31 = vmax.f32 %v250_v21, %v251_v25  ;;  %v259_v32 = vmax.f32 %v257_v22, %v258_v26 }
  0x25   : > { %v233_v33 = vmul.f32 %v231_v27, %v224_v30  ;;  %v253_v34 = vrot.slane %v252_v31, 2  ;;  %v260_v35 = vrot.slane %v259_v32, 2  ;;  %v232_v36 = vmul.f32 %v231_v27, %v217_v29 }
  0x27   : > { %v236_v37 = vrot.slane %v233_v33, 7  ;;  %v254_v38 = vmax.f32 %v252_v31, %v253_v34  ;;  %v261_v39 = vmax.f32 %v259_v32, %v260_v35 }
  0x29   : > { %v238_v40 = vsel %vm237_vm2, %v232_v36, %v236_v37  ;;  %v255_v41 = vrot.slane %v254_v38, 1  ;;  %v262_v42 = vrot.slane %v261_v39, 1 }
  0x2a   : > { %244 = vst.msk [vmem:[%s192_s20] sm:$0x3] %vm242_vm3, %v238_v40 }
  0x2b   : > { %v263_v43 = vmax.f32 %v261_v39, %v262_v42  ;;  %v256_v44 = vmax.f32 %v254_v38, %v255_v41 }
  0x2d   : > { %v266_v45 = vrot.slane %v263_v43, 7 }
  0x2f   : > { %v267_v46 = vsel %vm237_vm2, %v256_v44, %v266_v45 }
  0x30   : > { %269 = vst.msk [vmem:[%s201_s23] sm:$0x3] %vm242_vm3, %v267_v46 }
  0x31 PF: > { %s13_s11 = sadd.s32 1, %s456_s11   ;;  %s521_s9 = smov %s452_s10 }
  0x32   : > { %p10_p5 = scmp.ge.s32.totalorder %s13_s11, 4   ;;  %s522_s10 = smov %s524_s12 }
  0x34   :  { %12 = sbr.rel (!%p10_p5) target bundleno = 2 (0x2), region = 66 }

// kernel: spatial_attention_forward.3
= control target key start
LH: loop header
LB: loop body
LE: loop exit
PB: predicated region body
PF: predicated region fallthrough
CT: control target
= control target key end

     0   :  { %s429_s9 = smov 0   ;;  %s431_s10 = smov 0   ;;  %s469_s0 = inlined_call_operand.vmem [shape: f32[2,4,256], index: 0, kind: input, shape index: {}]   ;;  %s470_s1 = inlined_call_operand.vmem [shape: f32[2,1,256], index: 1, kind: input, shape index: {}]   ;;  %s471_s2 = inlined_call_operand.vmem [shape: f32[2,4,256], index: 2, kind: output, shape index: {}]  }
   0x1   :  { %s433_s11 = smov 0  }
   0x2 LB: > { %s24_s12 = sadd.s32 1, %s408_s10  ;;  %p352_p0 = scmp.ge.s32.totalorder %s412_s11, 1  ;;  %s412_s11 = sphi %s433_s11, %s12_s11   ;;  %s408_s10 = sphi %s431_s10, %s473_s10   ;;  %s404_s9 = sphi %s429_s9, %s472_s9  }
   0x3   : > { %p26_p1 = scmp.ge.s32.totalorder %s24_s12, 2  ;;  %p149_p2 = scmp.lt.s32.totalorder %s412_s11, 3 }
   0x5   : > { %s475_s12 = smov (%p26_p1, %s24_s12), 0  ;;  %p150_p3 = pnand %p352_p0, %p149_p2 }
   0x6   : > { %p188_p4 = scmp.lt.s32.totalorder (!%p150_p3), %s404_s9, 1 }
   0x7   : > { %153 = sbr.rel (%p150_p3) target bundleno = 54 (0x36), region = 28 }
   0xc   : > { %s477_s9 = smov (!%p188_p4, %s404_s9), 1  ;;  %vm241_vm4 = vcmask 1043456  }
   0xd   : > { %s355_s13 = sshll.u32 %s477_s9, 1  ;;  %s360_s17 = sshll.u32 %s477_s9, 3 }
   0xe   : > { %s204_s16 = scalar_lea.vmem %s470_s1, %s355_s13  ;;  %s195_s20 = scalar_lea.vmem %s469_s0, %s360_s17 }
   0xf   : > { %v216_v0 = vld [vmem:[%s204_s16] sm:$0x3]  ;;  %s214_s23 = scalar_lea.vmem %s471_s2, %s360_s17 }
  0x10   : > { %v217_v1 = vsub.f32 0.0, %v216_v0  ;;  %v236_v17 = vld [vmem:[%s195_s20] sm:$0xff] }
  0x12   : > { %v218_v2 = vmul.f32 1.442695, %v217_v1 }
  0x14   : > { %386 = vpow2.f32 %v218_v2 }
  0x1a   : > { %v387_v3 = vpop.eup %386 }
  0x1b   : > { %v220_v4 = vadd.f32 1.0, %v387_v3 }
  0x1d   : > { %388 = vrcp.f32 %v220_v4  ;;  %v232_v7 = vand.u32 2147483648, %v220_v4  ;;  %vm226_vm0 = vweird.f32 %v220_v4  ;;  %v230_v9 = vand.u32 2147483647, %v220_v4 }
  0x1f   : > { %v233_v11 = vor.u32 1.1754944e-38, %v232_v7  ;;  %vm231_vm3 = vcmp.eq.f32.partialorder %v230_v9, 8.507059e+37 }
  0x23   : > { %v389_v5 = vpop.eup %388 }
  0x24   : > { %v222_v6 = vmul.f32 %v389_v5, %v220_v4  ;;  %vm227_vm1 = vweird.f32 %v389_v5 }
  0x25   : > { %vm228_vm2 = vmor %vm226_vm0, %vm227_vm1 }
  0x26   : > { %v223_v8 = vsub.f32 1.0, %v222_v6 }
  0x28   : > { %v224_v10 = vmul.f32 %v389_v5, %v223_v8 }
  0x2a   : > { %v225_v12 = vadd.f32 %v389_v5, %v224_v10 }
  0x2c   : > { %v229_v13 = vsel %vm228_vm2, %v389_v5, %v225_v12 }
  0x2d   : > { %v234_v14 = vsel %vm231_vm3, %v233_v11, %v229_v13 }
  0x2e   : > { %v238_v15 = vperm.slane %v234_v14, 0  ;;  %v239_v16 = vperm.slane %v234_v14, 1 }
  0x30   : > { %v240_v18 = vrot.slane %v239_v16, 4 }
  0x32   : > { %v242_v19 = vsel %vm241_vm4, %v238_v15, %v240_v18 }
  0x33   : > { %v244_v20 = vmul.f32 %v242_v19, %v236_v17 }
  0x35   : > { %245 = vst [vmem:[%s214_s23] sm:$0xff] %v244_v20 }
  0x36 PF: > { %s12_s11 = sadd.s32 1, %s412_s11   ;;  %s472_s9 = smov %s408_s10 }
  0x37   : > { %p9_p5 = scmp.ge.s32.totalorder %s12_s11, 4   ;;  %s473_s10 = smov %s475_s12 }
  0x39   :  { %11 = sbr.rel (!%p9_p5) target bundleno = 2 (0x2), region = 61 }

</bundles_post_ra>
